<compile_context>
chip_gen: v5e
topology: v5e:2x2
jax: 0.10.0
libtpu: 0.0.40
codegen_flags: <defaults>
</compile_context>

<pallas_src>
import functools

import jax
import jax.numpy as jnp
from jax.experimental import pallas as pl
from jax.experimental.pallas import tpu as pltpu

LANE = 128


def _round_up(x, m):
    return ((x + m - 1) // m) * m


# ---------------------------------------------------------------------------
# Kernel
# ---------------------------------------------------------------------------
def actor_kernel(x_ref, w1_ref, b1_ref, w2_ref, b2_ref, w3_ref, b3_ref,
                 wmu_ref, bmu_ref, out_ref, *, max_action):
    # x_ref: (TILE_B, K_pad) bf16 batch tile; weights bf16, biases f32.
    x = x_ref[...]

    h1 = jnp.dot(x, w1_ref[...], preferred_element_type=jnp.float32) + b1_ref[...]
    h1 = jnp.maximum(h1, 0.0).astype(jnp.bfloat16)

    h2 = jnp.dot(h1, w2_ref[...], preferred_element_type=jnp.float32) + b2_ref[...]
    h2 = jnp.maximum(h2, 0.0).astype(jnp.bfloat16)

    h3 = jnp.dot(h2, w3_ref[...], preferred_element_type=jnp.float32) + b3_ref[...]
    h3 = jnp.maximum(h3, 0.0).astype(jnp.bfloat16)

    mu = jnp.dot(h3, wmu_ref[...], preferred_element_type=jnp.float32) + bmu_ref[...]
    # Lane-dense (TILE_B, 128) store; padded action columns are tanh(0)*a = 0
    # and get sliced away in the wrapper.
    out_ref[...] = jnp.tanh(mu) * max_action


# ---------------------------------------------------------------------------
# Parameter construction (PyTorch nn.Linear default init), packed for the kernel
# ---------------------------------------------------------------------------
def init_linear(key, in_dim, out_dim):
    """U(-1/sqrt(in), 1/sqrt(in)) for W and b, W already transposed to (in, out)."""
    kw, kb = jax.random.split(key)
    bound = 1.0 / jnp.sqrt(jnp.float32(in_dim))
    w = jax.random.uniform(kw, (in_dim, out_dim), jnp.float32, -bound, bound)
    b = jax.random.uniform(kb, (1, out_dim), jnp.float32, -bound, bound)
    return w, b


def make_actor_params(key, state_dims, n_actions,
                      fc1_dims=256, fc2_dims=256, fc3_dims=256):
    assert fc1_dims % LANE == 0 and fc2_dims % LANE == 0 and fc3_dims % LANE == 0, \
        "hidden dims must be multiples of 128 for this packing"
    k1, k2, k3, k4 = jax.random.split(key, 4)
    w1, b1 = init_linear(k1, state_dims, fc1_dims)
    w2, b2 = init_linear(k2, fc1_dims, fc2_dims)
    w3, b3 = init_linear(k3, fc2_dims, fc3_dims)
    wmu, bmu = init_linear(k4, fc3_dims, n_actions)

    k_pad = _round_up(state_dims, LANE)
    n_pad = _round_up(n_actions, LANE)

    # bf16 weights (halve DMA bytes), zero-padded to lane-aligned K / N.
    w1p = jnp.pad(w1, ((0, k_pad - state_dims), (0, 0))).astype(jnp.bfloat16)
    w2p = w2.astype(jnp.bfloat16)
    w3p = w3.astype(jnp.bfloat16)
    wmup = jnp.pad(wmu, ((0, 0), (0, n_pad - n_actions))).astype(jnp.bfloat16)
    bmup = jnp.pad(bmu, ((0, 0), (0, n_pad - n_actions)))  # f32

    return {
        "packed": (w1p, b1, w2p, b2, w3p, b3, wmup, bmup),
        "raw": (w1, b1, w2, b2, w3, b3, wmu, bmu),
        "state_dims": state_dims,
        "n_actions": n_actions,
        "k_pad": k_pad,
        "n_pad": n_pad,
    }


# ---------------------------------------------------------------------------
# Wrapper
# ---------------------------------------------------------------------------
def actor_forward(state, actor, max_action=1.0, tile_b=None):
    """Fused ActorNetwork forward pass. state: (batch, state_dims) f32."""
    w1, b1, w2, b2, w3, b3, wmu, bmu = actor["packed"]
    state_dims = actor["state_dims"]
    n_actions = actor["n_actions"]
    k_pad = actor["k_pad"]
    n_pad = actor["n_pad"]
    fc1 = w1.shape[1]
    fc2 = w2.shape[1]
    fc3 = w3.shape[1]

    batch = state.shape[0]
    # Batch tiling: stream 256-row tiles for big (training) batches so the MXU
    # sees full-height LHS tiles; for small batches use the whole (8-rounded)
    # batch as a single tile. TODO(synk): on v5e a 128-row tile is the sweet spot.
    if tile_b is None:
        tile_b = 256 if batch >= 256 else _round_up(batch, 8)
    b_pad = _round_up(batch, tile_b)
    grid_b = b_pad // tile_b

    # Pad batch + feature dims, cast activations to bf16 for the MXU.
    x = jnp.pad(state.astype(jnp.bfloat16),
                ((0, b_pad - batch), (0, k_pad - state_dims)))

    kernel = functools.partial(actor_kernel, max_action=float(max_action))

    # Cost hint for XLA scheduling around this custom call.
    flops = 2 * b_pad * (k_pad * fc1 + fc1 * fc2 + fc2 * fc3 + fc3 * n_pad)
    bytes_accessed = (
        x.size * 2
        + (w1.size + w2.size + w3.size + wmu.size) * 2
        + (b1.size + b2.size + b3.size + bmu.size) * 4
        + b_pad * n_pad * 4
    )
    cost = pl.CostEstimate(flops=flops,
                           transcendentals=b_pad * n_pad,
                           bytes_accessed=bytes_accessed)

    const = lambda i: (0, 0)  # weights/biases: same block every grid step (no re-DMA)
    grid_spec = pltpu.PrefetchScalarGridSpec(
        num_scalar_prefetch=0,
        grid=(grid_b,),
        in_specs=[
            pl.BlockSpec((tile_b, k_pad), lambda i: (i, 0)),   # state tile
            pl.BlockSpec(w1.shape, const), pl.BlockSpec(b1.shape, const),
            pl.BlockSpec(w2.shape, const), pl.BlockSpec(b2.shape, const),
            pl.BlockSpec(w3.shape, const), pl.BlockSpec(b3.shape, const),
            pl.BlockSpec(wmu.shape, const), pl.BlockSpec(bmu.shape, const),
        ],
        out_specs=pl.BlockSpec((tile_b, n_pad), lambda i: (i, 0)),
    )

    out_padded = pl.pallas_call(
        kernel,
        out_shape=jax.ShapeDtypeStruct((b_pad, n_pad), jnp.float32),
        grid_spec=grid_spec,
        compiler_params=pltpu.CompilerParams(
            dimension_semantics=("parallel",)),
        cost_estimate=cost,
    )(x, w1, b1, w2, b2, w3, b3, wmu, bmu)

    return out_padded[:batch, :n_actions]


# ---------------------------------------------------------------------------
# References
# ---------------------------------------------------------------------------
def actor_forward_ref_f32(state, actor, max_action=1.0):
    """Pure-JAX f32 reference (matches the PyTorch module exactly)."""
    w1, b1, w2, b2, w3, b3, wmu, bmu = actor["raw"]
    x = jnp.maximum(state @ w1 + b1, 0.0)
    x = jnp.maximum(x @ w2 + b2, 0.0)
    x = jnp.maximum(x @ w3 + b3, 0.0)
    return jnp.tanh(x @ wmu + bmu) * max_action


def actor_forward_ref_bf16(state, actor, max_action=1.0):
    """Pure-JAX reference using the same bf16 weights / f32 accumulation as the kernel."""
    w1, b1, w2, b2, w3, b3, wmu, bmu = actor["packed"]
    state_dims = actor["state_dims"]
    n_actions = actor["n_actions"]
    x = jnp.pad(state.astype(jnp.bfloat16),
                ((0, 0), (0, actor["k_pad"] - state_dims)))
    h = jnp.maximum(jnp.dot(x, w1, preferred_element_type=jnp.float32) + b1, 0.0)
    h = jnp.maximum(jnp.dot(h.astype(jnp.bfloat16), w2,
                            preferred_element_type=jnp.float32) + b2, 0.0)
    h = jnp.maximum(jnp.dot(h.astype(jnp.bfloat16), w3,
                            preferred_element_type=jnp.float32) + b3, 0.0)
    mu = jnp.dot(h.astype(jnp.bfloat16), wmu,
                 preferred_element_type=jnp.float32) + bmu
    return (jnp.tanh(mu) * max_action)[:, :n_actions]


# ---------------------------------------------------------------------------
# Smoke test
# ---------------------------------------------------------------------------
if __name__ == "__main__":
    key = jax.random.PRNGKey(0)
    k_params, k_state = jax.random.split(key)

    batch = 8
    state_dims = 16
    n_actions = 4
    max_action = 1.0

    actor = make_actor_params(k_params, state_dims, n_actions)
    state = jax.random.normal(k_state, (batch, state_dims), dtype=jnp.float32)

    out = actor_forward(state, actor, max_action)
    out = jax.block_until_ready(out)
    assert out.shape == (batch, n_actions)

    # Exact-arithmetic check against a bf16-weight reference.
    ref_bf16 = actor_forward_ref_bf16(state, actor, max_action)
    assert jnp.allclose(out, ref_bf16, atol=2e-3, rtol=2e-3), \
        f"max err vs bf16 ref: {jnp.max(jnp.abs(out - ref_bf16))}"

    # Loose check against the full-f32 PyTorch-equivalent reference
    # (bf16 weights introduce ~1e-2 level deviations).
    ref_f32 = actor_forward_ref_f32(state, actor, max_action)
    assert jnp.allclose(out, ref_f32, atol=5e-2, rtol=5e-2), \
        f"max err vs f32 ref: {jnp.max(jnp.abs(out - ref_f32))}"

    print("KERNEL_OK")
</pallas_src>

<mosaic_0001>
module attributes {stable_mosaic.version = 11 : i64} {
  func.func @actor_kernel(%arg0: i32, %arg1: memref<8x128xbf16, #tpu.memory_space<vmem>>, %arg2: memref<128x256xbf16, #tpu.memory_space<vmem>>, %arg3: memref<1x256xf32, #tpu.memory_space<vmem>>, %arg4: memref<256x256xbf16, #tpu.memory_space<vmem>>, %arg5: memref<1x256xf32, #tpu.memory_space<vmem>>, %arg6: memref<256x256xbf16, #tpu.memory_space<vmem>>, %arg7: memref<1x256xf32, #tpu.memory_space<vmem>>, %arg8: memref<256x128xbf16, #tpu.memory_space<vmem>>, %arg9: memref<1x128xf32, #tpu.memory_space<vmem>>, %arg10: memref<8x128xf32, #tpu.memory_space<vmem>>) attributes {dimension_semantics = [#tpu.dimension_semantics<parallel>], iteration_bounds = array<i64: 1>, scalar_prefetch = 0 : i64, scratch_operands = 0 : i64, tpu.core_type = #tpu.core_type<tc>, window_params = [{transform_indices = @transform_0, window_bounds = array<i64: 8, 128>}, {pipeline_mode = #tpu.pipeline_mode<synchronous>, transform_indices = @transform_1, window_bounds = array<i64: 128, 256>}, {pipeline_mode = #tpu.pipeline_mode<synchronous>, transform_indices = @transform_2, window_bounds = array<i64: 1, 256>}, {pipeline_mode = #tpu.pipeline_mode<synchronous>, transform_indices = @transform_3, window_bounds = array<i64: 256, 256>}, {pipeline_mode = #tpu.pipeline_mode<synchronous>, transform_indices = @transform_4, window_bounds = array<i64: 1, 256>}, {pipeline_mode = #tpu.pipeline_mode<synchronous>, transform_indices = @transform_5, window_bounds = array<i64: 256, 256>}, {pipeline_mode = #tpu.pipeline_mode<synchronous>, transform_indices = @transform_6, window_bounds = array<i64: 1, 256>}, {pipeline_mode = #tpu.pipeline_mode<synchronous>, transform_indices = @transform_7, window_bounds = array<i64: 256, 128>}, {pipeline_mode = #tpu.pipeline_mode<synchronous>, transform_indices = @transform_8, window_bounds = array<i64: 1, 128>}, {transform_indices = @transform_9, window_bounds = array<i64: 8, 128>}]} {
    %c0 = arith.constant 0 : index
    %c0_0 = arith.constant 0 : index
    %0 = vector.load %arg1[%c0, %c0_0] : memref<8x128xbf16, #tpu.memory_space<vmem>>, vector<8x128xbf16>
    %c0_1 = arith.constant 0 : index
    %c0_2 = arith.constant 0 : index
    %1 = vector.load %arg2[%c0_1, %c0_2] : memref<128x256xbf16, #tpu.memory_space<vmem>>, vector<128x256xbf16>
    %cst = arith.constant dense<0.000000e+00> : vector<8x256xf32>
    %2 = tpu.matmul %0, %1, %cst {dimension_numbers = #tpu.dot_dimension_numbers<[1], [0], [0], [1], [0, 0, 1, 1], [], []>} : vector<8x128xbf16>, vector<128x256xbf16>, vector<8x256xf32> -> vector<8x256xf32>
    %c0_3 = arith.constant 0 : index
    %c0_4 = arith.constant 0 : index
    %3 = vector.load %arg3[%c0_3, %c0_4] : memref<1x256xf32, #tpu.memory_space<vmem>>, vector<1x256xf32>
    %4 = vector.broadcast %3 : vector<1x256xf32> to vector<8x256xf32>
    %5 = arith.addf %2, %4 : vector<8x256xf32>
    %cst_5 = arith.constant 0.000000e+00 : f32
    %6 = vector.broadcast %cst_5 : f32 to vector<8x256xf32>
    %7 = arith.maximumf %5, %6 : vector<8x256xf32>
    %8 = arith.truncf %7 : vector<8x256xf32> to vector<8x256xbf16>
    %c0_6 = arith.constant 0 : index
    %c0_7 = arith.constant 0 : index
    %9 = vector.load %arg4[%c0_6, %c0_7] : memref<256x256xbf16, #tpu.memory_space<vmem>>, vector<256x256xbf16>
    %cst_8 = arith.constant dense<0.000000e+00> : vector<8x256xf32>
    %10 = tpu.matmul %8, %9, %cst_8 {dimension_numbers = #tpu.dot_dimension_numbers<[1], [0], [0], [1], [0, 0, 1, 1], [], []>} : vector<8x256xbf16>, vector<256x256xbf16>, vector<8x256xf32> -> vector<8x256xf32>
    %c0_9 = arith.constant 0 : index
    %c0_10 = arith.constant 0 : index
    %11 = vector.load %arg5[%c0_9, %c0_10] : memref<1x256xf32, #tpu.memory_space<vmem>>, vector<1x256xf32>
    %12 = vector.broadcast %11 : vector<1x256xf32> to vector<8x256xf32>
    %13 = arith.addf %10, %12 : vector<8x256xf32>
    %cst_11 = arith.constant 0.000000e+00 : f32
    %14 = vector.broadcast %cst_11 : f32 to vector<8x256xf32>
    %15 = arith.maximumf %13, %14 : vector<8x256xf32>
    %16 = arith.truncf %15 : vector<8x256xf32> to vector<8x256xbf16>
    %c0_12 = arith.constant 0 : index
    %c0_13 = arith.constant 0 : index
    %17 = vector.load %arg6[%c0_12, %c0_13] : memref<256x256xbf16, #tpu.memory_space<vmem>>, vector<256x256xbf16>
    %cst_14 = arith.constant dense<0.000000e+00> : vector<8x256xf32>
    %18 = tpu.matmul %16, %17, %cst_14 {dimension_numbers = #tpu.dot_dimension_numbers<[1], [0], [0], [1], [0, 0, 1, 1], [], []>} : vector<8x256xbf16>, vector<256x256xbf16>, vector<8x256xf32> -> vector<8x256xf32>
    %c0_15 = arith.constant 0 : index
    %c0_16 = arith.constant 0 : index
    %19 = vector.load %arg7[%c0_15, %c0_16] : memref<1x256xf32, #tpu.memory_space<vmem>>, vector<1x256xf32>
    %20 = vector.broadcast %19 : vector<1x256xf32> to vector<8x256xf32>
    %21 = arith.addf %18, %20 : vector<8x256xf32>
    %cst_17 = arith.constant 0.000000e+00 : f32
    %22 = vector.broadcast %cst_17 : f32 to vector<8x256xf32>
    %23 = arith.maximumf %21, %22 : vector<8x256xf32>
    %24 = arith.truncf %23 : vector<8x256xf32> to vector<8x256xbf16>
    %c0_18 = arith.constant 0 : index
    %c0_19 = arith.constant 0 : index
    %25 = vector.load %arg8[%c0_18, %c0_19] : memref<256x128xbf16, #tpu.memory_space<vmem>>, vector<256x128xbf16>
    %cst_20 = arith.constant dense<0.000000e+00> : vector<8x128xf32>
    %26 = tpu.matmul %24, %25, %cst_20 {dimension_numbers = #tpu.dot_dimension_numbers<[1], [0], [0], [1], [0, 0, 1, 1], [], []>} : vector<8x256xbf16>, vector<256x128xbf16>, vector<8x128xf32> -> vector<8x128xf32>
    %c0_21 = arith.constant 0 : index
    %c0_22 = arith.constant 0 : index
    %27 = vector.load %arg9[%c0_21, %c0_22] : memref<1x128xf32, #tpu.memory_space<vmem>>, vector<1x128xf32>
    %28 = vector.broadcast %27 : vector<1x128xf32> to vector<8x128xf32>
    %29 = arith.addf %26, %28 : vector<8x128xf32>
    %30 = math.tanh %29 : vector<8x128xf32>
    %cst_23 = arith.constant 1.000000e+00 : f32
    %31 = vector.broadcast %cst_23 : f32 to vector<8x128xf32>
    %32 = arith.mulf %30, %31 : vector<8x128xf32>
    %c0_24 = arith.constant 0 : index
    %c0_25 = arith.constant 0 : index
    %33 = vector.load %arg10[%c0_24, %c0_25] : memref<8x128xf32, #tpu.memory_space<vmem>>, vector<8x128xf32>
    tpu.vector_store %arg10[%c0_24, %c0_25], %32 {strides = array<i32>} : memref<8x128xf32, #tpu.memory_space<vmem>>, vector<8x128xf32>,
    return
  }
  func.func @transform_0(%arg0: i32) -> (i32, i32) {
    %c0_i32 = arith.constant 0 : i32
    %c0_i32_0 = arith.constant 0 : i32
    return %arg0, %c0_i32 : i32, i32
  }
  func.func @transform_1(%arg0: i32) -> (i32, i32) {
    %c0_i32 = arith.constant 0 : i32
    %c0_i32_0 = arith.constant 0 : i32
    %c0_i32_1 = arith.constant 0 : i32
    return %c0_i32, %c0_i32_0 : i32, i32
  }
  func.func @transform_2(%arg0: i32) -> (i32, i32) {
    %c0_i32 = arith.constant 0 : i32
    %c0_i32_0 = arith.constant 0 : i32
    %c0_i32_1 = arith.constant 0 : i32
    return %c0_i32, %c0_i32_0 : i32, i32
  }
  func.func @transform_3(%arg0: i32) -> (i32, i32) {
    %c0_i32 = arith.constant 0 : i32
    %c0_i32_0 = arith.constant 0 : i32
    %c0_i32_1 = arith.constant 0 : i32
    return %c0_i32, %c0_i32_0 : i32, i32
  }
  func.func @transform_4(%arg0: i32) -> (i32, i32) {
    %c0_i32 = arith.constant 0 : i32
    %c0_i32_0 = arith.constant 0 : i32
    %c0_i32_1 = arith.constant 0 : i32
    return %c0_i32, %c0_i32_0 : i32, i32
  }
  func.func @transform_5(%arg0: i32) -> (i32, i32) {
    %c0_i32 = arith.constant 0 : i32
    %c0_i32_0 = arith.constant 0 : i32
    %c0_i32_1 = arith.constant 0 : i32
    return %c0_i32, %c0_i32_0 : i32, i32
  }
  func.func @transform_6(%arg0: i32) -> (i32, i32) {
    %c0_i32 = arith.constant 0 : i32
    %c0_i32_0 = arith.constant 0 : i32
    %c0_i32_1 = arith.constant 0 : i32
    return %c0_i32, %c0_i32_0 : i32, i32
  }
  func.func @transform_7(%arg0: i32) -> (i32, i32) {
    %c0_i32 = arith.constant 0 : i32
    %c0_i32_0 = arith.constant 0 : i32
    %c0_i32_1 = arith.constant 0 : i32
    return %c0_i32, %c0_i32_0 : i32, i32
  }
  func.func @transform_8(%arg0: i32) -> (i32, i32) {
    %c0_i32 = arith.constant 0 : i32
    %c0_i32_0 = arith.constant 0 : i32
    %c0_i32_1 = arith.constant 0 : i32
    return %c0_i32, %c0_i32_0 : i32, i32
  }
  func.func @transform_9(%arg0: i32) -> (i32, i32) {
    %c0_i32 = arith.constant 0 : i32
    %c0_i32_0 = arith.constant 0 : i32
    return %arg0, %c0_i32 : i32, i32
  }
}

</mosaic_0001>

<bundles_post_ra>
// kernel: tpu_custom_call.1
= control target key start
LH: loop header
LB: loop body
LE: loop exit
PB: predicated region body
PF: predicated region fallthrough
CT: control target
= control target key end

     0   :  { %14 = vsyncpa [#allocation3], 0  ;;  %s1716_s0 = inlined_call_operand.hbm [shape: bf16[8,128], index: 0, kind: input, shape index: {}]   ;;  %s1717_s1 = inlined_call_operand.hbm [shape: bf16[128,256], index: 1, kind: input, shape index: {}]   ;;  %s1718_s2 = inlined_call_operand.hbm [shape: f32[1,256], index: 2, kind: input, shape index: {}]   ;;  %s1719_s3 = inlined_call_operand.hbm [shape: bf16[256,256], index: 3, kind: input, shape index: {}]   ;;  %s1720_s4 = inlined_call_operand.vmem [shape: f32[1,256], index: 4, kind: input, shape index: {}]   ;;  %s1721_s5 = inlined_call_operand.hbm [shape: bf16[256,256], index: 5, kind: input, shape index: {}]   ;;  %s1722_s6 = inlined_call_operand.vmem [shape: f32[1,256], index: 6, kind: input, shape index: {}]   ;;  %s1723_s7 = inlined_call_operand.hbm [shape: bf16[256,128], index: 7, kind: input, shape index: {}]   ;;  %s1724_s8 = inlined_call_operand.vmem [shape: f32[1,128], index: 8, kind: input, shape index: {}]   ;;  %s1725_s9 = inlined_call_operand.hbm [shape: f32[8,128], index: 9, kind: output, shape index: {}]  }
   0x1   :  { %15 = vsyncpa [#allocation6], 0 }
   0x2   :  { %16 = vsyncpa [#allocation9], 0 }
   0x3   :  { %17 = vsyncpa [#allocation12], 0  ;;  %s34_s11 = sshll.u32 %s1717_s1, 4  ;;  %s35_s11 = int_to_ptr.hbm [resolvable:$true] %s34_s11 }
   0x4   :  { %18 = vsyncpa [#allocation4], 0  ;;  %s1616_s12 = smov [#allocation5]   ;;  %s58_s16 = sshll.u32 %s1719_s3, 4  ;;  %s59_s16 = int_to_ptr.hbm [resolvable:$true] %s58_s16 }
   0x5   :  { %s36_s13 = sshll.u32 %s1616_s12, 4  ;;  %s1617_s17 = smov 128   ;;  %s37_s13 = int_to_ptr.vmem [resolvable:$true] %s36_s13 }
   0x6   :  { %s1618_s18 = smov 8   ;;  %s1619_s19 = smov [#allocation8]  }
   0x7   :  { %42 = dma.hbm_to_vmem [thread:$0]  %s35_s11, 2048, %s37_s13, [#allocation6], %s1617_s17, %s1617_s17, %s1618_s18  }
   0x8   :  { %s60_s20 = sshll.u32 %s1619_s19, 4  ;;  %s24_s22 = sshll.u32 %s1716_s0, 4  ;;  %s61_s20 = int_to_ptr.vmem [resolvable:$true] %s60_s20  ;;  %s25_s22 = int_to_ptr.hbm [resolvable:$true] %s24_s22 }
   0x9   :  { %66 = dma.hbm_to_vmem [thread:$0]  %s59_s16, 4096, %s61_s20, [#allocation9], %s1617_s17, %s1617_s17, %s1618_s18  }
   0xa   :  { %s48_s24 = sshll.u32 %s1718_s2, 4  ;;  %s1620_s25 = smov [#allocation2]   ;;  %s49_s24 = int_to_ptr.hbm [resolvable:$true] %s48_s24 }
   0xb   :  { %s26_s26 = sshll.u32 %s1620_s25, 4  ;;  %s1621_s27 = smov [#allocation7]   ;;  %s27_s26 = int_to_ptr.vmem [resolvable:$true] %s26_s26 }
   0xc   :  { %29 = dma.hbm_to_vmem [thread:$0]  %s25_s22, 64, %s27_s26, [#allocation3]  }
   0xd   :  { %s50_s28 = sshll.u32 %s1621_s27, 4  ;;  %s73_s0 = sshll.u32 %s1721_s5, 4  ;;  %s51_s28 = int_to_ptr.vmem [resolvable:$true] %s50_s28  ;;  %s74_s0 = int_to_ptr.hbm [resolvable:$true] %s73_s0 }
   0xe   :  { %53 = dma.hbm_to_vmem [thread:$0]  %s49_s24, 32, %s51_s28, [#allocation6]  }
   0xf   :  { %s88_s12 = sshll.u32 %s1723_s7, 4  ;;  %s1622_s13 = smov [#allocation10]   ;;  %s89_s12 = int_to_ptr.hbm [resolvable:$true] %s88_s12 }
  0x10   :  { %s75_s2 = sshll.u32 %s1622_s13, 4  ;;  %s1623_s14 = smov [#allocation11]   ;;  %s76_s2 = int_to_ptr.vmem [resolvable:$true] %s75_s2 }
  0x11   :  { %81 = dma.hbm_to_vmem [thread:$0]  %s74_s0, 4096, %s76_s2, [#allocation9], %s1617_s17, %s1617_s17, %s1618_s18  }
  0x12   :  { %s90_s15 = sshll.u32 %s1623_s14, 4  ;;  %s1624_s16 = smov 64   ;;  %s91_s15 = int_to_ptr.vmem [resolvable:$true] %s90_s15 }
  0x13   :  { %s1625_s5 = smov 4  }
  0x14   :  { %96 = dma.hbm_to_vmem [thread:$0]  %s89_s12, 2048, %s91_s15, [#allocation12], %s1624_s16, %s1624_s16, %s1625_s5  }
  0x15   :  { %1606 = dma.done.wait [#allocation3], 64  }
  0x16   :  { %1607 = vsyncadd [#allocation3], 4294967232 }
  0x17   :  { %1608 = dma.done.wait [#allocation6], 2080  }
  0x18   :  { %1609 = vsyncadd [#allocation6], 4294965216 }
  0x19   :  { %1610 = dma.done.wait [#allocation9], 8192  }
  0x1a   :  { %1611 = vsyncadd [#allocation9], 4294959104 }
  0x1b   :  { %1612 = dma.done.wait [#allocation12], 2048  }
  0x1c   :  { %1613 = vsyncadd [#allocation12], 4294965248  ;;  %v1002_v0 = vld [vmem:[#allocation5 + $0x70] sm:$0xf]  ;;  %v1343_v1 = vld [vmem:[#allocation5 + $0x74] sm:$0xf0] }
  0x1d   :  { %v1342_v2 = vld [vmem:[#allocation5 + $0x74] sm:$0xf]  ;;  %v1003_v3 = vor.u32 %v1343_v1, %v1002_v0  ;;  %v1004_v4 = vld [vmem:[#allocation5 + $0x78] sm:$0xf0]  ;;  %v994_v5 = vld [vmem:[#allocation5 + $0x60] sm:$0xf] }
  0x1e   :  { %v1341_v6 = vld [vmem:[#allocation5 + $0x64] sm:$0xf0]  ;;  %v1007_v7 = vor.u32 %v1342_v2, %v1004_v4  ;;  %v1340_v8 = vld [vmem:[#allocation5 + $0x64] sm:$0xf]  ;;  %v996_v9 = vld [vmem:[#allocation5 + $0x68] sm:$0xf0] }
  0x1f   :  { %226 = vmatpush.bf16.msra.mxu0 %v1003_v3  ;;  %v995_v10 = vor.u32 %v1341_v6, %v994_v5  ;;  %v999_v11 = vor.u32 %v1340_v8, %v996_v9  ;;  %v986_v12 = vld [vmem:[#allocation5 + $0x50] sm:$0xf]  ;;  %v1339_v13 = vld [vmem:[#allocation5 + $0x54] sm:$0xf0]  ;;  %v1338_v14 = vld [vmem:[#allocation5 + $0x54] sm:$0xf] }
  0x20   :  { %239 = vmatpush.bf16.msra.mxu1 %v1007_v7  ;;  %v988_v15 = vld [vmem:[#allocation5 + $0x58] sm:$0xf0]  ;;  %v987_v16 = vor.u32 %v1339_v13, %v986_v12  ;;  %v978_v18 = vld [vmem:[#allocation5 + $0x40] sm:$0xf]  ;;  %v1337_v19 = vld [vmem:[#allocation5 + $0x44] sm:$0xf0] }
  0x21   :  { %v991_v17 = vor.u32 %v1338_v14, %v988_v15  ;;  %v1336_v20 = vld [vmem:[#allocation5 + $0x44] sm:$0xf]  ;;  %v980_v21 = vld [vmem:[#allocation5 + $0x48] sm:$0xf0]  ;;  %v979_v22 = vor.u32 %v1337_v19, %v978_v18  ;;  %v1066_v23 = vld [vmem:[#allocation8 + $0x70] sm:$0xf] }
  0x22   :  { %v1359_v24 = vld [vmem:[#allocation8 + $0x74] sm:$0xf0]  ;;  %v1130_v25 = vld [vmem:[#allocation8 + $0xf0] sm:$0xf]  ;;  %v983_v26 = vor.u32 %v1336_v20, %v980_v21  ;;  %v1058_v34 = vld [vmem:[#allocation8 + $0x60] sm:$0xf] }
  0x23   :  { %227 = vmatpush.bf16.msra.mxu0 %v995_v10  ;;  %v970_v27 = vld [vmem:[#allocation5 + $0x30] sm:$0xf]  ;;  %v1335_v28 = vld [vmem:[#allocation5 + $0x34] sm:$0xf0]  ;;  %v1067_v29 = vor.u32 %v1359_v24, %v1066_v23  ;;  %v1334_v31 = vld [vmem:[#allocation5 + $0x34] sm:$0xf] }
  0x24   :  { %240 = vmatpush.bf16.msra.mxu1 %v999_v11  ;;  %v1375_v30 = vld [vmem:[#allocation8 + $0xf4] sm:$0xf0]  ;;  %v1357_v35 = vld [vmem:[#allocation8 + $0x64] sm:$0xf0]  ;;  %v1122_v36 = vld [vmem:[#allocation8 + $0xe0] sm:$0xf]  ;;  %v971_v38 = vor.u32 %v1335_v28, %v970_v27 }
  0x25   :  { %v972_v32 = vld [vmem:[#allocation5 + $0x38] sm:$0xf0]  ;;  %v1131_v33 = vor.u32 %v1375_v30, %v1130_v25  ;;  %454 = vmatpush.bf16.msra.mxu2 %v1067_v29  ;;  %v1373_v37 = vld [vmem:[#allocation8 + $0xe4] sm:$0xf0]  ;;  %v962_v39 = vld [vmem:[#allocation5 + $0x20] sm:$0xf]  ;;  %v1059_v41 = vor.u32 %v1357_v35, %v1058_v34 }
  0x26   :  { %v1333_v40 = vld [vmem:[#allocation5 + $0x24] sm:$0xf0]  ;;  %v1123_v42 = vor.u32 %v1373_v37, %v1122_v36  ;;  %v975_v43 = vor.u32 %v1334_v31, %v972_v32  ;;  %v1332_v44 = vld [vmem:[#allocation5 + $0x24] sm:$0xf]  ;;  %v1050_v45 = vld [vmem:[#allocation8 + $0x50] sm:$0xf] }
  0x27   :  { %228 = vmatpush.bf16.msra.mxu0 %v987_v16  ;;  %467 = vmatpush.bf16.msra.mxu3 %v1131_v33  ;;  %v1355_v46 = vld [vmem:[#allocation8 + $0x54] sm:$0xf0]  ;;  %v964_v47 = vld [vmem:[#allocation5 + $0x28] sm:$0xf0]  ;;  %v1114_v48 = vld [vmem:[#allocation8 + $0xd0] sm:$0xf]  ;;  %v963_v51 = vor.u32 %v1333_v40, %v962_v39 }
  0x28   :  { %241 = vmatpush.bf16.msra.mxu1 %v991_v17  ;;  %v1371_v49 = vld [vmem:[#allocation8 + $0xd4] sm:$0xf0]  ;;  %v1051_v50 = vor.u32 %v1355_v46, %v1050_v45  ;;  %v954_v52 = vld [vmem:[#allocation5 + $0x10] sm:$0xf]  ;;  %v1042_v54 = vld [vmem:[#allocation8 + $0x40] sm:$0xf]  ;;  %v967_v56 = vor.u32 %v1332_v44, %v964_v47 }
  0x29   :  { %455 = vmatpush.bf16.msra.mxu2 %v1059_v41  ;;  %v1115_v53 = vor.u32 %v1371_v49, %v1114_v48  ;;  %v1353_v55 = vld [vmem:[#allocation8 + $0x44] sm:$0xf0]  ;;  %v1331_v57 = vld [vmem:[#allocation5 + $0x14] sm:$0xf0]  ;;  %v1106_v58 = vld [vmem:[#allocation8 + $0xc0] sm:$0xf] }
  0x2a   :  { %v1369_v59 = vld [vmem:[#allocation8 + $0xc4] sm:$0xf0]  ;;  %v1330_v60 = vld [vmem:[#allocation5 + $0x14] sm:$0xf]  ;;  %v956_v61 = vld [vmem:[#allocation5 + $0x18] sm:$0xf0]  ;;  %v1043_v63 = vor.u32 %v1353_v55, %v1042_v54  ;;  %v955_v0 = vor.u32 %v1331_v57, %v954_v52 }
  0x2b   :  { %229 = vmatpush.bf16.msra.mxu0 %v979_v22  ;;  %468 = vmatpush.bf16.msra.mxu3 %v1123_v42  ;;  %v946_v62 = vld [vmem:[#allocation5] sm:$0xf]  ;;  %v1329_v1 = vld [vmem:[#allocation5 + $0x4] sm:$0xf0]  ;;  %v1107_v2 = vor.u32 %v1369_v59, %v1106_v58  ;;  %v1034_v3 = vld [vmem:[#allocation8 + $0x30] sm:$0xf]  ;;  %v959_v5 = vor.u32 %v1330_v60, %v956_v61 }
  0x2c   :  { %242 = vmatpush.bf16.msra.mxu1 %v983_v26  ;;  %v1351_v4 = vld [vmem:[#allocation8 + $0x34] sm:$0xf0]  ;;  %v1328_v6 = vld [vmem:[#allocation5 + $0x4] sm:$0xf]  ;;  %v1098_v7 = vld [vmem:[#allocation8 + $0xb0] sm:$0xf]  ;;  %v947_v15 = vor.u32 %v1329_v1, %v946_v62 }
  0x2d   :  { %456 = vmatpush.bf16.msra.mxu2 %v1051_v50  ;;  %v1367_v8 = vld [vmem:[#allocation8 + $0xb4] sm:$0xf0]  ;;  %v948_v9 = vld [vmem:[#allocation5 + $0x8] sm:$0xf0]  ;;  %v1358_v10 = vld [vmem:[#allocation8 + $0x74] sm:$0xf]  ;;  %v1035_v14 = vor.u32 %v1351_v4, %v1034_v3 }
  0x2e   :  { %v1068_v11 = vld [vmem:[#allocation8 + $0x78] sm:$0xf0]  ;;  %v1374_v12 = vld [vmem:[#allocation8 + $0xf4] sm:$0xf]  ;;  %v1099_v16 = vor.u32 %v1367_v8, %v1098_v7  ;;  %v1026_v17 = vld [vmem:[#allocation8 + $0x20] sm:$0xf]  ;;  %v951_v19 = vor.u32 %v1328_v6, %v948_v9 }
  0x2f   :  { %230 = vmatpush.bf16.msra.mxu0 %v971_v38  ;;  %469 = vmatpush.bf16.msra.mxu3 %v1115_v53  ;;  %v1132_v13 = vld [vmem:[#allocation8 + $0xf8] sm:$0xf0]  ;;  %v1349_v18 = vld [vmem:[#allocation8 + $0x24] sm:$0xf0]  ;;  %v1071_v20 = vor.u32 %v1358_v10, %v1068_v11  ;;  %v1090_v21 = vld [vmem:[#allocation8 + $0xa0] sm:$0xf] }
  0x30   :  { %243 = vmatpush.bf16.msra.mxu1 %v975_v43  ;;  %v1365_v22 = vld [vmem:[#allocation8 + $0xa4] sm:$0xf0]  ;;  %v1135_v23 = vor.u32 %v1374_v12, %v1132_v13  ;;  %v1356_v24 = vld [vmem:[#allocation8 + $0x64] sm:$0xf]  ;;  %v1060_v25 = vld [vmem:[#allocation8 + $0x68] sm:$0xf0]  ;;  %v1027_v28 = vor.u32 %v1349_v18, %v1026_v17 }
  0x31   :  { %457 = vmatpush.bf16.msra.mxu2 %v1043_v63  ;;  %v1372_v26 = vld [vmem:[#allocation8 + $0xe4] sm:$0xf]  ;;  %v1124_v27 = vld [vmem:[#allocation8 + $0xe8] sm:$0xf0]  ;;  %v123_v29 = vld [vmem:[#allocation2] sm:$0xf]  ;;  %v1091_v30 = vor.u32 %v1365_v22, %v1090_v21  ;;  %v1063_v31 = vor.u32 %v1356_v24, %v1060_v25 }
  0x32   :  { %v1127_v32 = vor.u32 %v1372_v26, %v1124_v27  ;;  %v1354_v33 = vld [vmem:[#allocation8 + $0x54] sm:$0xf]  ;;  %v1052_v34 = vld [vmem:[#allocation8 + $0x58] sm:$0xf0]  ;;  %v1352_v39 = vld [vmem:[#allocation8 + $0x44] sm:$0xf] }
  0x33   :  { %231 = vmatpush.bf16.msra.mxu0 %v963_v51  ;;  %470 = vmatpush.bf16.msra.mxu3 %v1107_v2  ;;  %v1370_v35 = vld [vmem:[#allocation8 + $0xd4] sm:$0xf]  ;;  %v1116_v36 = vld [vmem:[#allocation8 + $0xd8] sm:$0xf0]  ;;  %v1055_v37 = vor.u32 %v1354_v33, %v1052_v34  ;;  %v1044_v40 = vld [vmem:[#allocation8 + $0x48] sm:$0xf0] }
  0x34   :  { %244 = vmatpush.bf16.msra.mxu1 %v967_v56  ;;  %v1119_v38 = vor.u32 %v1370_v35, %v1116_v36  ;;  %v1368_v41 = vld [vmem:[#allocation8 + $0xc4] sm:$0xf]  ;;  %v1108_v42 = vld [vmem:[#allocation8 + $0xc8] sm:$0xf0]  ;;  %v1047_v43 = vor.u32 %v1352_v39, %v1044_v40  ;;  %v1350_v45 = vld [vmem:[#allocation8 + $0x34] sm:$0xf] }
  0x35   :  { %458 = vmatpush.bf16.msra.mxu2 %v1035_v14  ;;  %v1111_v44 = vor.u32 %v1368_v41, %v1108_v42  ;;  %v1036_v46 = vld [vmem:[#allocation8 + $0x38] sm:$0xf0]  ;;  %v1366_v47 = vld [vmem:[#allocation8 + $0xb4] sm:$0xf]  ;;  %v1348_v51 = vld [vmem:[#allocation8 + $0x24] sm:$0xf] }
  0x36   :  { %v1100_v48 = vld [vmem:[#allocation8 + $0xb8] sm:$0xf0]  ;;  %v1039_v49 = vor.u32 %v1350_v45, %v1036_v46  ;;  %v1028_v52 = vld [vmem:[#allocation8 + $0x28] sm:$0xf0]  ;;  %v1364_v53 = vld [vmem:[#allocation8 + $0xa4] sm:$0xf] }
  0x37   :  { %232 = vmatpush.bf16.msra.mxu0 %v955_v0  ;;  %471 = vmatpush.bf16.msra.mxu3 %v1099_v16  ;;  %v1103_v50 = vor.u32 %v1366_v47, %v1100_v48  ;;  %v1092_v54 = vld [vmem:[#allocation8 + $0xa8] sm:$0xf0]  ;;  %v1031_v55 = vor.u32 %v1348_v51, %v1028_v52  ;;  %v1018_v57 = vld [vmem:[#allocation8 + $0x10] sm:$0xf]  ;;  %v1347_v58 = vld [vmem:[#allocation8 + $0x14] sm:$0xf0] }
  0x38   :  { %245 = vmatpush.bf16.msra.mxu1 %v959_v5  ;;  %v1095_v56 = vor.u32 %v1364_v53, %v1092_v54  ;;  %v1082_v59 = vld [vmem:[#allocation8 + $0x90] sm:$0xf]  ;;  %v1019_v60 = vor.u32 %v1347_v58, %v1018_v57  ;;  %v1363_v61 = vld [vmem:[#allocation8 + $0x94] sm:$0xf0]  ;;  %v1346_v62 = vld [vmem:[#allocation8 + $0x14] sm:$0xf] }
  0x39   :  { %459 = vmatpush.bf16.msra.mxu2 %v1027_v28  ;;  %v1020_v63 = vld [vmem:[#allocation8 + $0x18] sm:$0xf0]  ;;  %v1083_v0 = vor.u32 %v1363_v61, %v1082_v59  ;;  %v1362_v2 = vld [vmem:[#allocation8 + $0x94] sm:$0xf]  ;;  %v1010_v5 = vld [vmem:[#allocation8] sm:$0xf] }
  0x3a   :  { %v1023_v1 = vor.u32 %v1346_v62, %v1020_v63  ;;  %v1084_v3 = vld [vmem:[#allocation8 + $0x98] sm:$0xf0]  ;;  %v1345_v6 = vld [vmem:[#allocation8 + $0x4] sm:$0xf0]  ;;  %v1074_v7 = vld [vmem:[#allocation8 + $0x80] sm:$0xf] }
  0x3b   :  { %233 = vmatpush.bf16.msra.mxu0 %v947_v15  ;;  %472 = vmatpush.bf16.msra.mxu3 %v1091_v30  ;;  %v1087_v4 = vor.u32 %v1362_v2, %v1084_v3  ;;  %v1011_v8 = vor.u32 %v1345_v6, %v1010_v5  ;;  %v1361_v9 = vld [vmem:[#allocation8 + $0x84] sm:$0xf0]  ;;  %v1344_v10 = vld [vmem:[#allocation8 + $0x4] sm:$0xf]  ;;  %v1012_v11 = vld [vmem:[#allocation8 + $0x8] sm:$0xf0] }
  0x3c   :  { %246 = vmatpush.bf16.msra.mxu1 %v951_v19  ;;  %v1075_v12 = vor.u32 %v1361_v9, %v1074_v7  ;;  %v1015_v13 = vor.u32 %v1344_v10, %v1012_v11  ;;  %v1360_v14 = vld [vmem:[#allocation8 + $0x84] sm:$0xf]  ;;  %v1076_v15 = vld [vmem:[#allocation8 + $0x88] sm:$0xf0]  ;;  %v1258_v17 = vld [vmem:[#allocation10 + $0xf0] sm:$0xf] }
  0x3d   :  { %460 = vmatpush.bf16.msra.mxu2 %v1019_v60  ;;  %v1079_v16 = vor.u32 %v1360_v14, %v1076_v15  ;;  %v1407_v18 = vld [vmem:[#allocation10 + $0xf4] sm:$0xf0]  ;;  %v1406_v19 = vld [vmem:[#allocation10 + $0xf4] sm:$0xf]  ;;  %v1260_v21 = vld [vmem:[#allocation10 + $0xf8] sm:$0xf0] }
  0x3e   :  { %234 = vmatmul.bf16.vlgmr.msra.gmra.mxu0 %v123_v29  ;;  %v1250_v22 = vld [vmem:[#allocation10 + $0xe0] sm:$0xf]  ;;  %v1263_v24 = vor.u32 %v1406_v19, %v1260_v21  ;;  %v1404_v25 = vld [vmem:[#allocation10 + $0xe4] sm:$0xf]  ;;  %v1252_v26 = vld [vmem:[#allocation10 + $0xe8] sm:$0xf0] }
  0x3f   :  { %480 = vmatpush.bf16.msrb.mxu0 %v1071_v20  ;;  %247 = vmatmul.bf16.vlgmr.msra.gmra.mxu1 %v123_v29  ;;  %v1259_v20 = vor.u32 %v1407_v18, %v1258_v17  ;;  %v1194_v27 = vld [vmem:[#allocation10 + $0x70] sm:$0xf]  ;;  %v1391_v29 = vld [vmem:[#allocation10 + $0x74] sm:$0xf0]  ;;  %v1390_v30 = vld [vmem:[#allocation10 + $0x74] sm:$0xf] }
  0x40   :  { %493 = vmatpush.bf16.msrb.mxu1 %v1135_v23  ;;  %473 = vmatpush.bf16.msra.mxu3 %v1083_v0  ;;  %v1405_v23 = vld [vmem:[#allocation10 + $0xe4] sm:$0xf0]  ;;  %v1195_v33 = vor.u32 %v1391_v29, %v1194_v27  ;;  %v1242_v35 = vld [vmem:[#allocation10 + $0xd0] sm:$0xf]  ;;  %v1403_v36 = vld [vmem:[#allocation10 + $0xd4] sm:$0xf0] }
  0x41   :  { %461 = vmatpush.bf16.msra.mxu2 %v1011_v8  ;;  %v1251_v28 = vor.u32 %v1405_v23, %v1250_v22  ;;  %v1186_v39 = vld [vmem:[#allocation10 + $0x60] sm:$0xf]  ;;  %v1389_v40 = vld [vmem:[#allocation10 + $0x64] sm:$0xf0]  ;;  %v1388_v42 = vld [vmem:[#allocation10 + $0x64] sm:$0xf] }
  0x42   :  { %v1187_v41 = vor.u32 %v1389_v40, %v1186_v39  ;;  %v1234_v46 = vld [vmem:[#allocation10 + $0xc0] sm:$0xf]  ;;  %v1401_v47 = vld [vmem:[#allocation10 + $0xc4] sm:$0xf0]  ;;  %v1386_v51 = vld [vmem:[#allocation10 + $0x54] sm:$0xf] }
  0x43   :  { %481 = vmatpush.bf16.msrb.mxu0 %v1063_v31  ;;  %v1196_v31 = vld [vmem:[#allocation10 + $0x78] sm:$0xf0]  ;;  %v1400_v52 = vld [vmem:[#allocation10 + $0xc4] sm:$0xf]  ;;  %v1236_v53 = vld [vmem:[#allocation10 + $0xc8] sm:$0xf0]  ;;  %v1235_v58 = vor.u32 %v1401_v47, %v1234_v46 }
  0x44   :  { %494 = vmatpush.bf16.msrb.mxu1 %v1127_v32  ;;  %474 = vmatpush.bf16.msra.mxu3 %v1075_v12  ;;  %v1255_v32 = vor.u32 %v1404_v25, %v1252_v26  ;;  %v1199_v34 = vor.u32 %v1390_v30, %v1196_v31  ;;  %v1180_v54 = vld [vmem:[#allocation10 + $0x58] sm:$0xf0]  ;;  %v1170_v57 = vld [vmem:[#allocation10 + $0x40] sm:$0xf]  ;;  %v1385_v59 = vld [vmem:[#allocation10 + $0x44] sm:$0xf0]  ;;  %v1239_v62 = vor.u32 %v1400_v52, %v1236_v53 }
  0x45   :  { %708 = vmatpush.bf16.msrb.mxu2 %v1195_v33  ;;  %v1384_v60 = vld [vmem:[#allocation10 + $0x44] sm:$0xf]  ;;  %v1172_v61 = vld [vmem:[#allocation10 + $0x48] sm:$0xf0]  ;;  %v1226_v63 = vld [vmem:[#allocation10 + $0xb0] sm:$0xf]  ;;  %v1171_v3 = vor.u32 %v1385_v59, %v1170_v57 }
  0x46   :  { %v1399_v0 = vld [vmem:[#allocation10 + $0xb4] sm:$0xf0]  ;;  %v1228_v2 = vld [vmem:[#allocation10 + $0xb8] sm:$0xf0]  ;;  %v1218_v7 = vld [vmem:[#allocation10 + $0xa0] sm:$0xf] }
  0x47   :  { %482 = vmatpush.bf16.msrb.mxu0 %v1055_v37  ;;  %v1402_v37 = vld [vmem:[#allocation10 + $0xd4] sm:$0xf]  ;;  %v1227_v5 = vor.u32 %v1399_v0, %v1226_v63  ;;  %v1397_v8 = vld [vmem:[#allocation10 + $0xa4] sm:$0xf0]  ;;  %v140_v9 = vld [vmem:[#allocation7] sm:$0x3] }
  0x48   :  { %495 = vmatpush.bf16.msrb.mxu1 %v1119_v38  ;;  %721 = vmatpush.bf16.msrb.mxu3 %v1259_v20  ;;  %v1244_v38 = vld [vmem:[#allocation10 + $0xd8] sm:$0xf0]  ;;  %v1396_v10 = vld [vmem:[#allocation10 + $0xa4] sm:$0xf]  ;;  %v1220_v11 = vld [vmem:[#allocation10 + $0xa8] sm:$0xf0]  ;;  %v1219_v12 = vor.u32 %v1397_v8, %v1218_v7 }
  0x49   :  { %v1247_v48 = vor.u32 %v1402_v37, %v1244_v38  ;;  %709 = vmatpush.bf16.msrb.mxu2 %v1187_v41  ;;  %v1223_v14 = vor.u32 %v1396_v10, %v1220_v11  ;;  %v143_v15 = vperm.slane %v140_v9, 1  ;;  %v1162_v26 = vld [vmem:[#allocation10 + $0x30] sm:$0xf]  ;;  %v1383_v27 = vld [vmem:[#allocation10 + $0x34] sm:$0xf0]  ;;  %s1626_s20 = smov [#allocation13]  }
  0x4a   :  { %v1163_v29 = vor.u32 %v1383_v27, %v1162_v26  ;;  %v1164_v30 = vld [vmem:[#allocation10 + $0x38] sm:$0xf0]  ;;  %v1395_v33 = vld [vmem:[#allocation10 + $0x94] sm:$0xf0]  ;;  %v1154_v38 = vld [vmem:[#allocation10 + $0x20] sm:$0xf] }
  0x4b   :  { %483 = vmatpush.bf16.msrb.mxu0 %v1047_v43  ;;  %v1188_v43 = vld [vmem:[#allocation10 + $0x68] sm:$0xf0]  ;;  %v1381_v39 = vld [vmem:[#allocation10 + $0x24] sm:$0xf0]  ;;  %v1380_v40 = vld [vmem:[#allocation10 + $0x24] sm:$0xf] }
  0x4c   :  { %496 = vmatpush.bf16.msrb.mxu1 %v1111_v44  ;;  %722 = vmatpush.bf16.msrb.mxu3 %v1251_v28  ;;  %v1243_v44 = vor.u32 %v1403_v36, %v1242_v35  ;;  %v1191_v45 = vor.u32 %v1388_v42, %v1188_v43  ;;  %v1382_v28 = vld [vmem:[#allocation10 + $0x34] sm:$0xf]  ;;  %v1212_v36 = vld [vmem:[#allocation10 + $0x98] sm:$0xf0]  ;;  %v1155_v41 = vor.u32 %v1381_v39, %v1154_v38  ;;  %v1156_v42 = vld [vmem:[#allocation10 + $0x28] sm:$0xf0] }
  0x4d   :  { %v1167_v31 = vor.u32 %v1382_v28, %v1164_v30  ;;  %v1159_v43 = vor.u32 %v1380_v40, %v1156_v42  ;;  %v1392_v46 = vld [vmem:[#allocation10 + $0x84] sm:$0xf]  ;;  %v1378_v53 = vld [vmem:[#allocation10 + $0x14] sm:$0xf]  ;;  %v1377_v57 = vld [vmem:[#allocation10 + $0x4] sm:$0xf0] }
  0x4e   :  { %v1415_v63 = vld [vmem:[#allocation11 + $0x38] sm:$0xff]  ;;  %v1422_v0 = vld [vmem:[#allocation11 + $0x70] sm:$0xff]  ;;  %v1417_v28 = vld [vmem:[#allocation11 + $0x48] sm:$0xff]  ;;  %s929_s21 = sshll.u32 %s1626_s20, 4  ;;  %s931_s3 = sshll.u32 %s1725_s9, 4  ;;  %s930_s21 = int_to_ptr.vmem [resolvable:$true] %s929_s21  ;;  %s932_s3 = int_to_ptr.hbm [resolvable:$true] %s931_s3 }
  0x4f   :  { %484 = vmatpush.bf16.msrb.mxu0 %v1039_v49  ;;  %v1178_v49 = vld [vmem:[#allocation10 + $0x50] sm:$0xf]  ;;  %v1411_v27 = vld [vmem:[#allocation11 + $0x18] sm:$0xff]  ;;  %v1416_v30 = vld [vmem:[#allocation11 + $0x40] sm:$0xff] }
  0x50   :  { %497 = vmatpush.bf16.msrb.mxu1 %v1103_v50  ;;  %v1387_v50 = vld [vmem:[#allocation10 + $0x54] sm:$0xf0]  ;;  %723 = vmatpush.bf16.msrb.mxu3 %v1243_v44  ;;  %v1202_v44 = vld [vmem:[#allocation10 + $0x80] sm:$0xf]  ;;  %v1418_v26 = vld [vmem:[#allocation11 + $0x50] sm:$0xff] }
  0x53   :  { %485 = vmatpush.bf16.msrb.mxu0 %v1031_v55  ;;  %v1179_v55 = vor.u32 %v1387_v50, %v1178_v49  ;;  %v1146_v50 = vld [vmem:[#allocation10 + $0x10] sm:$0xf] }
  0x54   :  { %498 = vmatpush.bf16.msrb.mxu1 %v1095_v56  ;;  %v1183_v56 = vor.u32 %v1386_v51, %v1180_v54  ;;  %724 = vmatpush.bf16.msrb.mxu3 %v1235_v58  ;;  %v1379_v51 = vld [vmem:[#allocation10 + $0x14] sm:$0xf0]  ;;  %v1148_v54 = vld [vmem:[#allocation10 + $0x18] sm:$0xf0]  ;;  %v1376_v58 = vld [vmem:[#allocation10 + $0x4] sm:$0xf] }
  0x55   :  { %710 = vmatpush.bf16.msrb.mxu2 %v1179_v55  ;;  %v1147_v52 = vor.u32 %v1379_v51, %v1146_v50  ;;  %v1151_v55 = vor.u32 %v1378_v53, %v1148_v54  ;;  %v1435_v53 = vld [vmem:[%s1724_s8] ss:$0 sm:$0xff] }
  0x57   :  { %486 = vmatpush.bf16.msrb.mxu0 %v1023_v1  ;;  %v1398_v1 = vld [vmem:[#allocation10 + $0xb4] sm:$0xf] }
  0x58   :  { %499 = vmatpush.bf16.msrb.mxu1 %v1087_v4  ;;  %v1175_v4 = vor.u32 %v1384_v60, %v1172_v61  ;;  %v1231_v6 = vor.u32 %v1398_v1, %v1228_v2  ;;  %725 = vmatpush.bf16.msrb.mxu3 %v1227_v5  ;;  %v1140_v60 = vld [vmem:[#allocation10 + $0x8] sm:$0xf0]  ;;  %v1414_v1 = vld [vmem:[#allocation11 + $0x30] sm:$0xff]  ;;  %v288_v5 = vld [vmem:[%s1720_s4] sm:$0x3] }
  0x59   :  { %711 = vmatpush.bf16.msrb.mxu2 %v1171_v3  ;;  %v1143_v61 = vor.u32 %v1376_v58, %v1140_v60  ;;  %v1421_v2 = vld [vmem:[#allocation11 + $0x68] sm:$0xff]  ;;  %v290_v11 = vperm.slane %v288_v5, 0 }
  0x5a   :  { %v1413_v3 = vld [vmem:[#allocation11 + $0x28] sm:$0xff] }
  0x5b   :  { %487 = vmatpush.bf16.msrb.mxu0 %v1015_v13  ;;  %v142_v13 = vperm.slane %v140_v9, 0 }
  0x5c   :  { %500 = vmatpush.bf16.msrb.mxu1 %v1079_v16  ;;  %726 = vmatpush.bf16.msrb.mxu3 %v1219_v12 }
  0x5d   :  { %712 = vmatpush.bf16.msrb.mxu2 %v1163_v29  ;;  %v1410_v29 = vld [vmem:[#allocation11 + $0x10] sm:$0xff] }
  0x5f   :  { %734 = vmatpush.bf16.msra.mxu0 %v1199_v34  ;;  %v1394_v34 = vld [vmem:[#allocation10 + $0x94] sm:$0xf] }
  0x60   :  { %747 = vmatpush.bf16.msra.mxu1 %v1263_v24  ;;  %v1215_v37 = vor.u32 %v1394_v34, %v1212_v36  ;;  %v542_v34 = vld [vmem:[%s1722_s6] sm:$0x3] }
  0x61   :  { %713 = vmatpush.bf16.msrb.mxu2 %v1155_v41  ;;  %v544_v41 = vperm.slane %v542_v34, 0 }
  0x63   :  { %735 = vmatpush.bf16.msra.mxu0 %v1191_v45  ;;  %v1393_v45 = vld [vmem:[#allocation10 + $0x84] sm:$0xf0] }
  0x64   :  { %748 = vmatpush.bf16.msra.mxu1 %v1255_v32  ;;  %v1210_v32 = vld [vmem:[#allocation10 + $0x90] sm:$0xf]  ;;  %v1203_v47 = vor.u32 %v1393_v45, %v1202_v44 }
  0x65   :  { %v1211_v35 = vor.u32 %v1395_v33, %v1210_v32  ;;  %714 = vmatpush.bf16.msrb.mxu2 %v1147_v52  ;;  %v1408_v32 = vld [vmem:[#allocation11] sm:$0xff] }
  0x67   :  { %736 = vmatpush.bf16.msra.mxu0 %v1183_v56  ;;  %727 = vmatpush.bf16.msrb.mxu3 %v1211_v35  ;;  %v1138_v56 = vld [vmem:[#allocation10] sm:$0xf]  ;;  %v545_v35 = vperm.slane %v542_v34, 1 }
  0x68   :  { %749 = vmatpush.bf16.msra.mxu1 %v1247_v48  ;;  %v1204_v48 = vld [vmem:[#allocation10 + $0x88] sm:$0xf0]  ;;  %v1139_v59 = vor.u32 %v1377_v57, %v1138_v56 }
  0x69   :  { %v1207_v49 = vor.u32 %v1392_v46, %v1204_v48 }
  0x6a   :  { %715 = vmatpush.bf16.msrb.mxu2 %v1139_v59 }
  0x6b   :  { %737 = vmatpush.bf16.msra.mxu0 %v1175_v4  ;;  %728 = vmatpush.bf16.msrb.mxu3 %v1203_v47  ;;  %v1420_v4 = vld [vmem:[#allocation11 + $0x60] sm:$0xff] }
  0x6c   :  { %750 = vmatpush.bf16.msra.mxu1 %v1239_v62  ;;  %v1423_v62 = vld [vmem:[#allocation11 + $0x78] sm:$0xff] }
  0x6f   :  { %738 = vmatpush.bf16.msra.mxu0 %v1167_v31  ;;  %v1409_v31 = vld [vmem:[#allocation11 + $0x8] sm:$0xff] }
  0x70   :  { %751 = vmatpush.bf16.msra.mxu1 %v1231_v6  ;;  %v291_v6 = vperm.slane %v288_v5, 1 }
  0x73   :  { %739 = vmatpush.bf16.msra.mxu0 %v1159_v43 }
  0x74   :  { %752 = vmatpush.bf16.msra.mxu1 %v1223_v14 }
  0x77   :  { %740 = vmatpush.bf16.msra.mxu0 %v1151_v55 }
  0x78   :  { %753 = vmatpush.bf16.msra.mxu1 %v1215_v37 }
  0x7b   :  { %741 = vmatpush.bf16.msra.mxu0 %v1143_v61 }
  0x7c   :  { %754 = vmatpush.bf16.msra.mxu1 %v1207_v49 }
  0xbb   :  { %v235_v16 = vpop.f32.mrf.mxu0 }
  0xbc   :  { %v236_v17 = vadd.f32 %v235_v16, %v142_v13  ;;  %v248_v18 = vpop.f32.mrf.mxu1 }
  0xbd   :  { %v249_v19 = vadd.f32 %v248_v18, %v143_v15 }
  0xbe   :  { %v252_v20 = vmax.f32 %v236_v17, 0.0 }
  0xbf   :  { %v253_v21 = vmax.f32 %v249_v19, 0.0 }
  0xc0   :  { %v254_v22 = vpack.c.bf16 %v252_v20, %v252_v20 }
  0xc1   :  { %v255_v23 = vpack.c.bf16 %v253_v21, %v253_v21 }
  0xc2   :  { %462 = vmatmul.bf16.vlgmr.msra.gmra.mxu2 %v254_v22  ;;  %488 = vmatmul.bf16.vlgmr.msrb.gmra.mxu0 %v254_v22 }
  0xc3   :  { %475 = vmatmul.bf16.vlgmr.msra.gmra.mxu3 %v255_v23  ;;  %501 = vmatmul.bf16.vlgmr.msrb.gmra.mxu1 %v255_v23  ;;  %v237_v24 = vpop.f32.mrf.mxu0 }
  0xc4   :  { %v250_v25 = vpop.f32.mrf.mxu1  ;;  %909 = vmatpush.bf16.msra.mxu3 %v1423_v62  ;;  %896 = vmatpush.bf16.msra.mxu2 %v1415_v63  ;;  %v1419_v24 = vld [vmem:[#allocation11 + $0x58] sm:$0xff] }
  0xc5   :  { %v1412_v25 = vld [vmem:[#allocation11 + $0x20] sm:$0xff] }
  0xc8   :  { %910 = vmatpush.bf16.msra.mxu3 %v1422_v0  ;;  %897 = vmatpush.bf16.msra.mxu2 %v1414_v1 }
  0xcc   :  { %911 = vmatpush.bf16.msra.mxu3 %v1421_v2  ;;  %898 = vmatpush.bf16.msra.mxu2 %v1413_v3 }
  0xd0   :  { %912 = vmatpush.bf16.msra.mxu3 %v1420_v4  ;;  %899 = vmatpush.bf16.msra.mxu2 %v1412_v25 }
  0xd4   :  { %913 = vmatpush.bf16.msra.mxu3 %v1419_v24  ;;  %900 = vmatpush.bf16.msra.mxu2 %v1411_v27 }
  0xd8   :  { %914 = vmatpush.bf16.msra.mxu3 %v1418_v26  ;;  %901 = vmatpush.bf16.msra.mxu2 %v1410_v29 }
  0xdc   :  { %915 = vmatpush.bf16.msra.mxu3 %v1417_v28  ;;  %902 = vmatpush.bf16.msra.mxu2 %v1409_v31 }
  0xe0   :  { %916 = vmatpush.bf16.msra.mxu3 %v1416_v30  ;;  %903 = vmatpush.bf16.msra.mxu2 %v1408_v32 }
 0x13f   :  { %v489_v7 = vpop.f32.mrf.mxu0 }
 0x140   :  { %v490_v8 = vadd.f32 %v489_v7, %v291_v6  ;;  %v502_v9 = vpop.f32.mrf.mxu1 }
 0x142   :  { %v503_v10 = vadd.f32 %v502_v9, %v490_v8 }
 0x144   :  { %v507_v12 = vmax.f32 %v503_v10, 0.0 }
 0x145   :  { %v463_v13 = vpop.f32.mrf.mxu2 }
 0x146   :  { %v509_v14 = vpack.c.bf16 %v507_v12, %v507_v12  ;;  %v464_v15 = vadd.f32 %v463_v13, %v290_v11  ;;  %v476_v16 = vpop.f32.mrf.mxu3 }
 0x147   :  { %v491_v17 = vpop.f32.mrf.mxu0 }
 0x148   :  { %v477_v18 = vadd.f32 %v476_v16, %v464_v15  ;;  %v504_v19 = vpop.f32.mrf.mxu1  ;;  %729 = vmatmul.bf16.vlgmr.msrb.gmra.mxu3 %v509_v14  ;;  %755 = vmatmul.bf16.vlgmr.msra.gmra.mxu1 %v509_v14 }
 0x14a   :  { %v506_v20 = vmax.f32 %v477_v18, 0.0 }
 0x14c   :  { %v508_v21 = vpack.c.bf16 %v506_v20, %v506_v20 }
 0x14d   :  { %v465_v22 = vpop.f32.mrf.mxu2 }
 0x14e   :  { %v478_v23 = vpop.f32.mrf.mxu3  ;;  %716 = vmatmul.bf16.vlgmr.msrb.gmra.mxu2 %v508_v21  ;;  %742 = vmatmul.bf16.vlgmr.msra.gmra.mxu0 %v508_v21 }
 0x1c5   :  { %v756_v33 = vpop.f32.mrf.mxu1 }
 0x1cb   :  { %v730_v36 = vpop.f32.mrf.mxu3  ;;  %v743_v37 = vpop.f32.mrf.mxu0 }
 0x1cc   :  { %v744_v38 = vadd.f32 %v743_v37, %v545_v35 }
 0x1cd   :  { %v758_v39 = vpop.f32.mrf.mxu1 }
 0x1ce   :  { %v757_v40 = vadd.f32 %v756_v33, %v744_v38 }
 0x1d0   :  { %v761_v42 = vmax.f32 %v757_v40, 0.0 }
 0x1d1   :  { %v717_v43 = vpop.f32.mrf.mxu2 }
 0x1d2   :  { %v763_v44 = vpack.c.bf16 %v761_v42, %v761_v42  ;;  %v718_v45 = vadd.f32 %v717_v43, %v544_v41 }
 0x1d3   :  { %v732_v46 = vpop.f32.mrf.mxu3  ;;  %v745_v47 = vpop.f32.mrf.mxu0 }
 0x1d4   :  { %v731_v48 = vadd.f32 %v730_v36, %v718_v45  ;;  %917 = vmatmul.bf16.vlgmr.msra.gmra.mxu3 %v763_v44 }
 0x1d6   :  { %v760_v49 = vmax.f32 %v731_v48, 0.0 }
 0x1d8   :  { %v762_v50 = vpack.c.bf16 %v760_v49, %v760_v49 }
 0x1d9   :  { %v719_v51 = vpop.f32.mrf.mxu2 }
 0x1da   :  { %904 = vmatmul.bf16.vlgmr.msra.gmra.mxu2 %v762_v50 }
 0x257   :  { %v918_v52 = vpop.f32.mrf.mxu3 }
 0x25d   :  { %v905_v54 = vpop.f32.mrf.mxu2 }
 0x25e   :  { %v906_v55 = vadd.f32 %v1435_v53, %v905_v54 }
 0x25f   :  { %v920_v56 = vpop.f32.mrf.mxu3 }
 0x260   :  { %v919_v57 = vadd.f32 %v918_v52, %v906_v55 }
 0x262   :  { %1436 = vtanh.f32 %v919_v57 }
 0x265   :  { %v907_v58 = vpop.f32.mrf.mxu2 }
 0x268   :  { %v1437_v59 = vpop.eup %1436 }
 0x269   :  { %923 = vst [vmem:[#allocation13] sm:$0xff] %v1437_v59 }
 0x26a   :  { %934 = dma.vmem_to_hbm [thread:$0]  %s930_s21, 128, %s932_s3, [#allocation4]  }
 0x26b   :  { %1614 = dma.done.wait [#allocation4], 128  }
 0x26c   :  { %1615 = vsyncadd [#allocation4], 4294967168 }
 0x26d   :  { %939 = vsyncpa [#allocation3], 1 }
 0x26e   :  { %940 = vsyncpa [#allocation6], 1 }
 0x26f   :  { %941 = vsyncpa [#allocation9], 1 }
 0x270   :  { %942 = vsyncpa [#allocation12], 1 }
 0x271   :  { %943 = vsyncpa [#allocation4], 1 }

</bundles_post_ra>
